<compile_context>
chip_gen: v6e
topology: v6e:2x2x1
jax: 0.10.0
libtpu: 0.0.40
codegen_flags: <defaults>
</compile_context>

<pallas_src>
import jax
import jax.numpy as jnp
from jax.experimental import pallas as pl
from jax.experimental.pallas import tpu as pltpu


def _round_up(n, m):
    return ((n + m - 1) // m) * m


def _cdiv(a, b):
    return -(-a // b)


def titanic_mlp_kernel(xt_ref, w1t_ref, w2_ref, b2_ref, o_ref):
    # xt_ref : (Fp, TB)  input tile (feature-major, ones-row appended), batch on lanes
    # w1t_ref: (H, Fp)   first-layer weights^T with b1 folded in; VMEM-resident
    # w2_ref : (H, 1)    second-layer weight column (f32)
    # b2_ref : (1,)      second-layer bias, SMEM scalar (f32)
    # o_ref  : (1, TB)   lane-dense output tile (f32)

    # Layer 1 + bias on the MXU: (H, Fp) @ (Fp, TB) -> (H, TB), f32 accumulation.
    h = jnp.dot(w1t_ref[...], xt_ref[...], preferred_element_type=jnp.float32)
    # ReLU on the VPU.
    h = jnp.maximum(h, 0.0)
    # Layer 2 (output width 1): VPU multiply + sublane reduce (XLU) instead of a
    # 1-column MXU matmul.  Result is already lane-dense: (1, TB).
    y = jnp.sum(h * w2_ref[...], axis=0, keepdims=True)
    o_ref[...] = y + b2_ref[0]


def titanic_mlp(x, w1, b1, w2, b2, *, use_bf16=False, target_steps=8, tb_cap=65536):
    """Forward pass of TitanicModel.  x: (B, F) -> (B, 1) f32.

    w1: (F, H), b1: (1, H), w2: (H, 1), b2: (1, 1), i.e. y = relu(x@w1+b1)@w2+b2
    (same math as nn.Linear, which computes x @ W.T + b).
    """
    B, F = x.shape
    H = w1.shape[1]
    assert w1.shape == (F, H)
    assert b1.shape == (1, H)
    assert w2.shape == (H, 1)
    assert b2.shape == (1, 1)

    stream_dtype = jnp.bfloat16 if use_bf16 else jnp.float32

    # --- batch tile selection -------------------------------------------------
    # Multiple of 128 (lane-dense output), sized so padding stays < 128 columns,
    # the grid keeps >= target_steps steps for pipelining / megacore sharding,
    # and VMEM stays within the v7x budget (tb_cap).
    tb = _round_up(max(1, _cdiv(B, target_steps)), 128)
    tb = max(128, min(tb, tb_cap))
    Bp = _round_up(B, tb)

    # --- layout plumbing (single fused XLA pre-pass over x) --------------------
    # Feature-major slab with an appended ones-row (for the folded b1) and zero
    # rows up to the sublane multiple Fp; b1 goes into the matching W1^T column.
    Fp = _round_up(F + 1, 8)
    xt = jnp.concatenate(
        [
            x.T.astype(jnp.float32),
            jnp.ones((1, B), jnp.float32),
            jnp.zeros((Fp - F - 1, B), jnp.float32),
        ],
        axis=0,
    )
    xt = jnp.pad(xt, ((0, 0), (0, Bp - B))).astype(stream_dtype)            # (Fp, Bp)

    w1t = jnp.concatenate(
        [
            w1.T.astype(jnp.float32),
            b1.reshape(H, 1).astype(jnp.float32),
            jnp.zeros((H, Fp - F - 1), jnp.float32),
        ],
        axis=1,
    ).astype(stream_dtype)                                                   # (H, Fp)

    w2c = w2.reshape(H, 1).astype(jnp.float32)                               # (H, 1)
    b2s = b2.reshape(1).astype(jnp.float32)                                  # (1,) SMEM

    grid = (Bp // tb,)

    out = pl.pallas_call(
        titanic_mlp_kernel,
        out_shape=jax.ShapeDtypeStruct((1, Bp), jnp.float32),
        grid=grid,
        in_specs=[
            pl.BlockSpec((Fp, tb), lambda i: (0, i)),     # x tile marches over batch
            pl.BlockSpec((H, Fp), lambda i: (0, 0)),      # W1^T(+b1): VMEM-resident
            pl.BlockSpec((H, 1), lambda i: (0, 0)),       # w2 column: VMEM-resident
            pl.BlockSpec(memory_space=pltpu.MemorySpace.SMEM),  # b2 scalar in SMEM
        ],
        out_specs=pl.BlockSpec((1, tb), lambda i: (0, i)),       # lane-dense output
        compiler_params=pltpu.CompilerParams(
            dimension_semantics=("parallel",),            # megacore sharding on v7x
            vmem_limit_bytes=48 * 1024 * 1024,            # > v5e 16 MiB default,
                                                          # < v7x 64 MiB physical
        ),
    )(xt, w1t, w2c, b2s)

    # Back to the PyTorch-module output shape (B, 1).
    # TODO(synk): drop this slice/reshape (a tiny extra XLA op) if the consumer
    # can take the (1, Bp) lane-dense slab directly.
    return out[0, :B].reshape(B, 1)


def init_params(key, input_dim, hidden_dim=32):
    # Deterministic init mimicking nn.Linear's U(-1/sqrt(fan_in), 1/sqrt(fan_in)).
    k1, k2, k3, k4 = jax.random.split(key, 4)
    bound1 = 1.0 / jnp.sqrt(jnp.float32(input_dim))
    bound2 = 1.0 / jnp.sqrt(jnp.float32(hidden_dim))
    w1 = jax.random.uniform(k1, (input_dim, hidden_dim), jnp.float32, -bound1, bound1)
    b1 = jax.random.uniform(k2, (1, hidden_dim), jnp.float32, -bound1, bound1)
    w2 = jax.random.uniform(k3, (hidden_dim, 1), jnp.float32, -bound2, bound2)
    b2 = jax.random.uniform(k4, (1, 1), jnp.float32, -bound2, bound2)
    return w1, b1, w2, b2


def _reference(x, w1, b1, w2, b2):
    return jnp.maximum(x @ w1 + b1, 0.0) @ w2 + b2


if __name__ == "__main__":
    key = jax.random.PRNGKey(0)
    input_dim = 7       # Titanic selected-feature count (tabular features)
    hidden_dim = 32

    kx, kp, kx2 = jax.random.split(key, 3)
    w1, b1, w2, b2 = init_params(kp, input_dim, hidden_dim)

    # Small-batch check (single 128-wide tile, grid=(1,)), exact f32 path.
    batch = 8
    x = jax.random.normal(kx, (batch, input_dim), dtype=jnp.float32)
    out = jax.block_until_ready(titanic_mlp(x, w1, b1, w2, b2))
    ref = _reference(x, w1, b1, w2, b2)
    assert out.shape == (batch, 1)
    assert jnp.allclose(out, ref, atol=1e-5, rtol=1e-5)

    # Multi-tile check: B=1000 -> tb=128, Bp=1024, grid=(8,); exercises the batch
    # grid, padding (<128 cols), folded-bias rows, and the pipelined path.
    big_batch = 1000
    xb = jax.random.normal(kx2, (big_batch, input_dim), dtype=jnp.float32)
    outb = jax.block_until_ready(titanic_mlp(xb, w1, b1, w2, b2))
    refb = _reference(xb, w1, b1, w2, b2)
    assert outb.shape == (big_batch, 1)
    assert jnp.allclose(outb, refb, atol=1e-5, rtol=1e-5)

    # bf16-streaming path (halves the dominant HBM stream); looser tolerance since
    # x / W1 are quantized to bf16, all accumulation / VPU math stays f32.
    outb_bf16 = jax.block_until_ready(
        titanic_mlp(xb, w1, b1, w2, b2, use_bf16=True))
    assert outb_bf16.shape == (big_batch, 1)
    assert jnp.allclose(outb_bf16, refb, atol=3e-2, rtol=3e-2)

    print("KERNEL_OK")
</pallas_src>

<mosaic_0001>
module attributes {stable_mosaic.version = 11 : i64} {
  func.func @titanic_mlp_kernel(%arg0: i32, %arg1: memref<8x128xf32, #tpu.memory_space<vmem>>, %arg2: memref<32x8xf32, #tpu.memory_space<vmem>>, %arg3: memref<32x1xf32, #tpu.memory_space<vmem>>, %arg4: memref<1xf32, #tpu.memory_space<smem>>, %arg5: memref<1x128xf32, #tpu.memory_space<vmem>>) attributes {dimension_semantics = [#tpu.dimension_semantics<parallel>], iteration_bounds = array<i64: 1>, scalar_prefetch = 0 : i64, scratch_operands = 0 : i64, tpu.core_type = #tpu.core_type<tc>, window_params = [{transform_indices = @transform_0, window_bounds = array<i64: 8, 128>}, {pipeline_mode = #tpu.pipeline_mode<synchronous>, transform_indices = @transform_1, window_bounds = array<i64: 32, 8>}, {pipeline_mode = #tpu.pipeline_mode<synchronous>, transform_indices = @transform_2, window_bounds = array<i64: 32, 1>}, {transform_indices = @transform_3, window_bounds = array<i64: 1>}, {transform_indices = @transform_4, window_bounds = array<i64: 1, 128>}]} {
    %c0 = arith.constant 0 : index
    %c0_0 = arith.constant 0 : index
    %0 = vector.load %arg2[%c0, %c0_0] : memref<32x8xf32, #tpu.memory_space<vmem>>, vector<32x8xf32>
    %c0_1 = arith.constant 0 : index
    %c0_2 = arith.constant 0 : index
    %1 = vector.load %arg1[%c0_1, %c0_2] : memref<8x128xf32, #tpu.memory_space<vmem>>, vector<8x128xf32>
    %cst = arith.constant dense<0.000000e+00> : vector<32x128xf32>
    %2 = tpu.matmul %0, %1, %cst {dimension_numbers = #tpu.dot_dimension_numbers<[1], [0], [0], [1], [0, 0, 1, 1], [], []>} : vector<32x8xf32>, vector<8x128xf32>, vector<32x128xf32> -> vector<32x128xf32>
    %cst_3 = arith.constant 0.000000e+00 : f32
    %3 = vector.broadcast %cst_3 : f32 to vector<32x128xf32>
    %4 = arith.maximumf %2, %3 : vector<32x128xf32>
    %c0_4 = arith.constant 0 : index
    %c0_5 = arith.constant 0 : index
    %5 = vector.load %arg3[%c0_4, %c0_5] : memref<32x1xf32, #tpu.memory_space<vmem>>, vector<32x1xf32>
    %6 = vector.broadcast %5 : vector<32x1xf32> to vector<32x128xf32>
    %7 = arith.mulf %4, %6 : vector<32x128xf32>
    %cst_6 = arith.constant dense<0.000000e+00> : vector<128xf32>
    %8 = vector.multi_reduction <add>, %7, %cst_6 [0] : vector<32x128xf32> to vector<128xf32>
    %9 = vector.shape_cast %8 : vector<128xf32> to vector<1x128xf32>
    %c0_7 = arith.constant 0 : index
    %10 = memref.load %arg4[%c0_7] : memref<1xf32, #tpu.memory_space<smem>>
    %11 = vector.broadcast %10 : f32 to vector<1x128xf32>
    %12 = arith.addf %9, %11 : vector<1x128xf32>
    %c0_8 = arith.constant 0 : index
    %c0_9 = arith.constant 0 : index
    %13 = vector.load %arg5[%c0_8, %c0_9] : memref<1x128xf32, #tpu.memory_space<vmem>>, vector<1x128xf32>
    tpu.vector_store %arg5[%c0_8, %c0_9], %12 {strides = array<i32>} : memref<1x128xf32, #tpu.memory_space<vmem>>, vector<1x128xf32>,
    return
  }
  func.func @transform_0(%arg0: i32) -> (i32, i32) {
    %c0_i32 = arith.constant 0 : i32
    %c0_i32_0 = arith.constant 0 : i32
    return %c0_i32, %arg0 : i32, i32
  }
  func.func @transform_1(%arg0: i32) -> (i32, i32) {
    %c0_i32 = arith.constant 0 : i32
    %c0_i32_0 = arith.constant 0 : i32
    %c0_i32_1 = arith.constant 0 : i32
    return %c0_i32, %c0_i32_0 : i32, i32
  }
  func.func @transform_2(%arg0: i32) -> (i32, i32) {
    %c0_i32 = arith.constant 0 : i32
    %c0_i32_0 = arith.constant 0 : i32
    %c0_i32_1 = arith.constant 0 : i32
    return %c0_i32, %c0_i32_0 : i32, i32
  }
  func.func @transform_3(%arg0: i32) -> i32 {
    %c0_i32 = arith.constant 0 : i32
    %c0_i32_0 = arith.constant 0 : i32
    return %c0_i32 : i32
  }
  func.func @transform_4(%arg0: i32) -> (i32, i32) {
    %c0_i32 = arith.constant 0 : i32
    %c0_i32_0 = arith.constant 0 : i32
    return %c0_i32, %arg0 : i32, i32
  }
}

</mosaic_0001>

<bundles_post_ra>
// kernel: tpu_custom_call.1
= control target key start
LH: loop header
LB: loop body
LE: loop exit
PB: predicated region body
PF: predicated region fallthrough
CT: control target
= control target key end

     0   :  { %vm24_vm0 = vcmask 64512   ;;  %s286_s0 = inlined_call_operand.vmem [shape: f32[8,128], index: 0, kind: input, shape index: {}]   ;;  %s287_s1 = inlined_call_operand.vmem [shape: f32[32,8], index: 1, kind: input, shape index: {}]   ;;  %s288_s2 = inlined_call_operand.vmem [shape: f32[32,1], index: 2, kind: input, shape index: {}]   ;;  %s289_s3 = inlined_call_operand.<no memory space> [shape: f32[1], index: 3, kind: input, shape index: {}]   ;;  %s290_s4 = inlined_call_operand.hbm [shape: f32[1,128], index: 4, kind: output, shape index: {}]  }
   0x1   :  { %v23_v0 = vld [vmem:[%s286_s0] sm:$0xff]  ;;  %v21_v2 = vld [vmem:[%s287_s1 + $0x10] sm:$0xff]  ;;  %v20_v3 = vld [vmem:[%s287_s1 + $0x8] sm:$0xff] }
   0x2   :  { %v19_v1 = vld [vmem:[%s287_s1] sm:$0xff]  ;;  %190 = vmatprep.subr.mxu0 %v23_v0  ;;  %198 = vmatprep.subr.mxu1 %v23_v0  ;;  %v22_v4 = vld [vmem:[%s287_s1 + $0x18] sm:$0xff]  ;;  %v128_v6 = vld [vmem:[%s288_s2 + $0x10] sm:$0xff] }
   0x3   :  { %191 = vmatpush3.msra.mxu0 %v23_v0  ;;  %199 = vmatpush3.msra.mxu1 %v23_v0  ;;  %v126_v5 = vld [vmem:[%s288_s2] sm:$0xff] }
   0x4   :  { %192 = vmatprep.mubr.msk.f32.mxu0 %vm24_vm0, %v19_v1  ;;  %195 = vmatprep.mubr.msk.f32.mxu1 %vm24_vm0, %v21_v2 }
   0x5   :  { %10 = vsyncpa [#allocation4], 0  ;;  %193 = vmatmul.mubr.msk.f32.vlgmr.msra.gmra.mxu0 %vm24_vm0, %v20_v3  ;;  %196 = vmatmul.mubr.msk.f32.vlgmr.msra.gmra.mxu1 %vm24_vm0, %v22_v4  ;;  %v226_v7 = vmov 0   ;;  %v127_v8 = vld [vmem:[%s288_s2 + $0x8] sm:$0xff]  ;;  %v129_v9 = vld [vmem:[%s288_s2 + $0x18] sm:$0xff]  ;;  %v164_v34 = vstv %s289_s3  ;;  %s227_s6 = smov [#allocation3]  }
   0x6   :  { %202 = vset.pattern.permute.xlu0 %v226_v7  ;;  %203 = vset.pattern.permute.xlu1 %v226_v7  ;;  %s173_s7 = sshll.u32 %s227_s6, 4  ;;  %s174_s7 = int_to_ptr.vmem [resolvable:$true] %s173_s7 }
   0x7   :  { %132 = vperm.xlu0 %202, %v126_v5   ;;  %142 = vperm.xlu1 %203, %v128_v6   ;;  %s204_s8 = scalar_lea.vmem %s174_s7, 16  ;;  %s208_s9 = scalar_lea.vmem %s174_s7, 32 }
   0x8   :  { %p205_p0 = scmp.ne.s32.totalorder %s174_s7, %s204_s8  ;;  %p209_p1 = scmp.lt.s32.totalorder %s174_s7, %s174_s7 }
   0x9   :  { %p210_p2 = scmp.lt.s32.totalorder %s208_s9, %s204_s8 }
   0xb   :  { %137 = vperm.xlu0 %202, %v127_v8   ;;  %147 = vperm.xlu1 %203, %v129_v9   ;;  %p211_p3 = por %p210_p2, %p209_p1 }
   0xd   :  { %p212_p4 = pnand %p211_p3, %p205_p0 }
  0x82   :  { %v133_v10 = vpop.permute.xlu0 %132  ;;  %v143_v11 = vpop.permute.xlu1 %142 }
  0x86   :  { %v138_v19 = vpop.permute.xlu0 %137  ;;  %v148_v23 = vpop.permute.xlu1 %147 }
  0xc5   :  { %v194_v12 = vpop.f32.mrf.mxu0  ;;  %v197_v13 = vpop.f32.mrf.mxu1 }
  0xc6   :  { %v123_v14 = vmax.f32 %v194_v12, 0.0  ;;  %v125_v21 = vmax.f32 %v197_v13, 0.0 }
  0xc7   :  { %v103_v15 = vpop.f32.mrf.mxu0  ;;  %v113_v16 = vpop.f32.mrf.mxu1 }
  0xc8   :  { %v122_v17 = vmax.f32 %v103_v15, 0.0  ;;  %v124_v18 = vmax.f32 %v113_v16, 0.0  ;;  %v151_v20 = vmul.f32 %v138_v19, %v123_v14  ;;  %v153_v27 = vmul.f32 %v148_v23, %v125_v21 }
  0xca   :  { %v150_v22 = vmul.f32 %v133_v10, %v122_v17  ;;  %v152_v25 = vmul.f32 %v143_v11, %v124_v18 }
  0xcc   :  { %v154_v24 = vadd.f32 %v151_v20, %v150_v22 }
  0xce   :  { %v155_v26 = vadd.f32 %v154_v24, %v152_v25 }
  0xd0   :  { %v156_v28 = vadd.f32 %v155_v26, %v153_v27 }
  0xd2   :  { %v157_v29 = vrot.slane %v156_v28, 4 }
  0xd4   :  { %v158_v30 = vadd.f32 %v157_v29, %v156_v28 }
  0xd6   :  { %v159_v31 = vrot.slane %v158_v30, 2 }
  0xd8   :  { %v160_v32 = vadd.f32 %v159_v31, %v158_v30 }
  0xda   :  { %v161_v33 = vrot.slane %v160_v32, 1 }
  0xdc   :  { %v162_v35 = vadd.f32 %v161_v33, %v160_v32 }
  0xde   :  { %v165_v36 = vadd.f32 %v164_v34, %v162_v35 }
  0xe0   :  { %166 = vst [vmem:[#allocation3] sm:$0x1] %v165_v36 }
  0xe1   :  { %215 = shalt.err (!%p212_p4)
}
  0xe2   :  { %176 = dma.vmem_to_hbm [thread:$0]  %s174_s7, 16, %s290_s4, [#allocation4]  }
  0xe3   :  { %224 = dma.done.wait [#allocation4], 16  }
  0xe4   :  { %225 = vsyncadd [#allocation4], 4294967280 }
  0xe5   :  { %180 = vsyncpa [#allocation4], 1 }

</bundles_post_ra>
